<compile_context>
chip_gen: v7x
topology: tpu7x:2x2x1
jax: 0.10.0
libtpu: 0.0.40
codegen_flags: <defaults>
</compile_context>

<pallas_src>
import functools

import numpy as np

import jax
import jax.numpy as jnp
from jax import lax
from jax.experimental import pallas as pl
from jax.experimental.pallas import tpu as pltpu

NSPLIT = 2            # leading "parallel" grid axis (v7x has 2 TensorCores)


def _round_up(a, b):
    return ((a + b - 1) // b) * b


def _pick_tile_config():
    """(frames per grid step, vmem_limit_bytes) per chip generation.

    512-row tiles on 128-MiB-VMEM parts (v5e/v6e); 256 on v7x's 64 MiB VMEM."""
    try:
        vmem_bytes = int(pltpu.get_tpu_info().vmem_capacity_bytes)
    except Exception:
        vmem_bytes = 64 << 20
    if vmem_bytes >= (100 << 20):
        return 512, 96 * 1024 * 1024
    return 256, 48 * 1024 * 1024


def _stft_loss_kernel(xf_ref, yf_ref, basis_ref, d2_ref, ysq_ref, labs_ref,
                      *, tile_rows, blocks_per_core, n_valid_rows, n_bins_pad):
    """One (tile_rows, k_pad) tile of windowed frames -> fused bf16 DFT matmul ->
    lane-dense f32 partial-loss accumulators (reduced across grid axis 1)."""
    c = pl.program_id(0)   # parallel: per-core split of the frame tiles
    j = pl.program_id(1)   # arbitrary: reduction over frame tiles

    @pl.when(j == 0)
    def _():
        d2_ref[...] = jnp.zeros_like(d2_ref)
        ysq_ref[...] = jnp.zeros_like(ysq_ref)
        labs_ref[...] = jnp.zeros_like(labs_ref)

    basis = basis_ref[...]     # bf16 (k_pad, 2*n_bins_pad), window folded in

    # MXU: one fused matmul per signal gives [re | im] for all kept bins.
    # Back-to-back with the identical RHS so the basis weight-push is reused.
    xri = jnp.dot(xf_ref[...], basis, preferred_element_type=jnp.float32)
    yri = jnp.dot(yf_ref[...], basis, preferred_element_type=jnp.float32)

    # 128-aligned lane slices (no relayout).
    xr, xi = xri[:, :n_bins_pad], xri[:, n_bins_pad:]
    yr, yi = yri[:, :n_bins_pad], yri[:, n_bins_pad:]

    # torch: mag = sqrt(clamp(re^2 + im^2, min=1e-7))
    xs2 = jnp.maximum(xr * xr + xi * xi, 1e-7)
    ys2 = jnp.maximum(yr * yr + yi * yi, 1e-7)

    # (y_mag - x_mag)^2 with a single EUP sqrt; zero-padded rows add exactly 0.
    d2_ref[...] += ys2 + xs2 - 2.0 * jnp.sqrt(ys2 * xs2)
    # 2*|log y_mag - log x_mag| with a single EUP log; padded rows give log(1)=0.
    labs_ref[...] += jnp.abs(jnp.log(ys2 / xs2))

    # |y_mag|^2 accumulator needs row masking only on the tile that straddles
    # the last valid frame row; interior tiles add unmasked, fully-padded skip.
    row0 = (c * blocks_per_core + j) * tile_rows

    @pl.when(row0 + tile_rows <= n_valid_rows)
    def _():
        ysq_ref[...] += ys2

    @pl.when(jnp.logical_and(row0 < n_valid_rows,
                             row0 + tile_rows > n_valid_rows))
    def _():
        row_ids = row0 + lax.broadcasted_iota(jnp.int32, (tile_rows, 1), 0)
        ysq_ref[...] += jnp.where(row_ids < n_valid_rows, ys2, 0.0)


def _build_basis_np(fft_size, win_length, n_bins_pad, k_pad):
    """Window-folded DFT basis for bins 0..fft//2-1 plus the Nyquist row,
    built with numpy so they become compile-time constants."""
    lpad = (fft_size - win_length) // 2            # torch centers the window
    n = np.arange(win_length)
    w = 0.5 * (1.0 - np.cos(2.0 * np.pi * n / win_length))   # periodic Hann
    pos = lpad + n                                  # sample position in the n_fft frame
    ff = np.arange(n_bins_pad)
    k = (pos[:, None] * ff[None, :]) % fft_size     # exact angle via int mod
    ang = (2.0 * np.pi / fft_size) * k.astype(np.float64)
    basis = np.zeros((k_pad, 2 * n_bins_pad), np.float32)
    basis[:win_length, :n_bins_pad] = (np.cos(ang) * w[:, None]).astype(np.float32)
    basis[:win_length, n_bins_pad:] = (np.sin(ang) * w[:, None]).astype(np.float32)
    # Nyquist bin (f = fft//2): imag part is exactly 0, real uses cos(pi*pos)=(-1)^pos.
    nyq = (np.where(pos % 2 == 0, 1.0, -1.0) * w).astype(np.float32)
    return basis, nyq, lpad


def _frame_signal(x, fft_size, hop, win_length, lpad):
    """torch.stft(center=True, pad_mode='reflect') framing, trimmed to the
    win_length samples under the centered window: (B, n_frames, win_length)."""
    B, T = x.shape
    pad = fft_size // 2
    x_pad = jnp.pad(x, ((0, 0), (pad, pad)), mode="reflect")
    n_frames = 1 + (T + 2 * pad - fft_size) // hop
    idx = (jnp.arange(n_frames)[:, None] * hop + lpad
           + jnp.arange(win_length)[None, :])
    return x_pad[:, idx], n_frames


def stft_loss(x, y, fft_size=1024, shift_size=120, win_length=600):
    """Equivalent of STFTLoss.forward: returns (sc_loss, mag_loss)."""
    x = x.astype(jnp.float32)
    y = y.astype(jnp.float32)
    B, _ = x.shape
    hop = shift_size
    n_bins = fft_size // 2 + 1          # torch onesided bins (incl. Nyquist)
    n_bins_k = n_bins - 1               # bins computed in the kernel (lane-dense)
    n_bins_pad = _round_up(n_bins_k, 128)
    k_pad = _round_up(win_length, 128)  # matmul K = windowed support, 128-aligned

    basis_np, nyq_np, lpad = _build_basis_np(fft_size, win_length, n_bins_pad, k_pad)
    basis = jnp.asarray(basis_np).astype(jnp.bfloat16)
    nyq = jnp.asarray(nyq_np)

    # --- glue: framing (reflect-padded, hop-strided, window-support only) -----
    xf, n_frames = _frame_signal(x, fft_size, hop, win_length, lpad)
    yf, _ = _frame_signal(y, fft_size, hop, win_length, lpad)
    rows = B * n_frames
    xf = xf.reshape(rows, win_length)
    yf = yf.reshape(rows, win_length)

    # Nyquist bin handled on the host in f32 (one matvec per signal).
    x_nyq = xf @ nyq
    y_nyq = yf @ nyq

    tile_rows, vmem_limit = _pick_tile_config()
    tile_rows = min(tile_rows, _round_up(rows, 8))
    nblk = pl.cdiv(rows, tile_rows)
    bpc = pl.cdiv(nblk, NSPLIT)                 # frame tiles per core
    rows_pad = bpc * NSPLIT * tile_rows

    # bf16 MXU operands, zero-padded rows / K columns (both sides of the pad are
    # zero so padded rows and K columns contribute nothing).
    xf = jnp.pad(xf, ((0, rows_pad - rows),
                      (0, k_pad - win_length))).astype(jnp.bfloat16)
    yf = jnp.pad(yf, ((0, rows_pad - rows),
                      (0, k_pad - win_length))).astype(jnp.bfloat16)

    kernel = functools.partial(
        _stft_loss_kernel, tile_rows=tile_rows, blocks_per_core=bpc,
        n_valid_rows=rows, n_bins_pad=n_bins_pad)

    acc_shape = jax.ShapeDtypeStruct((NSPLIT * tile_rows, n_bins_pad), jnp.float32)
    acc_spec = pl.BlockSpec((tile_rows, n_bins_pad), lambda c, j: (c, 0))
    frame_spec = pl.BlockSpec((tile_rows, k_pad), lambda c, j: (c * bpc + j, 0))

    cost = pl.CostEstimate(
        flops=2 * 2 * rows_pad * k_pad * 2 * n_bins_pad,
        transcendentals=3 * rows_pad * n_bins_pad,
        bytes_accessed=(2 * 2 * rows_pad * k_pad            # bf16 frames (x, y)
                        + 2 * k_pad * 2 * n_bins_pad        # bf16 basis
                        + 4 * 3 * NSPLIT * tile_rows * n_bins_pad),
    )

    d2, ysq, labs = pl.pallas_call(
        kernel,
        out_shape=(acc_shape, acc_shape, acc_shape),
        grid_spec=pltpu.PrefetchScalarGridSpec(
            num_scalar_prefetch=0,
            grid=(NSPLIT, bpc),
            in_specs=[
                frame_spec,                                                  # x frames
                frame_spec,                                                  # y frames
                pl.BlockSpec((k_pad, 2 * n_bins_pad), lambda c, j: (0, 0)),  # basis (resident)
            ],
            out_specs=(acc_spec, acc_spec, acc_spec),
        ),
        compiler_params=pltpu.CompilerParams(
            dimension_semantics=("parallel", "arbitrary"),
            vmem_limit_bytes=vmem_limit),
        cost_estimate=cost,
    )(xf, yf, basis)

    # Single cross-lane reduction on the lane-dense accumulators (host glue).
    # Columns >= n_bins_k are padding bins and are simply never read.
    sum_diff2 = jnp.sum(d2[:, :n_bins_k])
    sum_ysq = jnp.sum(ysq[:, :n_bins_k])
    sum_labs = 0.5 * jnp.sum(labs[:, :n_bins_k])

    # Add the host-computed Nyquist bin (imag part is exactly zero).
    xs2_n = jnp.maximum(x_nyq * x_nyq, 1e-7)
    ys2_n = jnp.maximum(y_nyq * y_nyq, 1e-7)
    sum_diff2 += jnp.sum(ys2_n + xs2_n - 2.0 * jnp.sqrt(ys2_n * xs2_n))
    sum_ysq += jnp.sum(ys2_n)
    sum_labs += 0.5 * jnp.sum(jnp.abs(jnp.log(ys2_n / xs2_n)))

    sc_loss = jnp.sqrt(sum_diff2) / jnp.sqrt(sum_ysq)   # Frobenius-norm ratio
    mag_loss = sum_labs / (rows * n_bins)               # L1 mean of log magnitudes
    return sc_loss, mag_loss


if __name__ == "__main__":
    # Small, module-consistent shapes: B=2 signals of length T=512,
    # STFTLoss(fft_size=256, shift_size=64, win_length=192).
    key = jax.random.PRNGKey(0)
    kx, ky = jax.random.split(key)
    B, T = 2, 512
    x = 0.5 * jax.random.normal(kx, (B, T), dtype=jnp.float32)
    y = 0.5 * jax.random.normal(ky, (B, T), dtype=jnp.float32)

    sc_loss, mag_loss = jax.jit(
        functools.partial(stft_loss, fft_size=256, shift_size=64, win_length=192)
    )(x, y)
    jax.block_until_ready((sc_loss, mag_loss))
    print("KERNEL_OK")
</pallas_src>

<mosaic_0001>
module attributes {stable_mosaic.version = 11 : i64} {
  func.func @_stft_loss_kernel(%arg0: i32, %arg1: i32, %arg2: memref<24x256xbf16, #tpu.memory_space<vmem>>, %arg3: memref<24x256xbf16, #tpu.memory_space<vmem>>, %arg4: memref<256x256xbf16, #tpu.memory_space<vmem>>, %arg5: memref<24x128xf32, #tpu.memory_space<vmem>>, %arg6: memref<24x128xf32, #tpu.memory_space<vmem>>, %arg7: memref<24x128xf32, #tpu.memory_space<vmem>>) attributes {dimension_semantics = [#tpu.dimension_semantics<parallel>, #tpu.dimension_semantics<arbitrary>], iteration_bounds = array<i64: 2, 1>, scalar_prefetch = 0 : i64, scratch_operands = 0 : i64, tpu.core_type = #tpu.core_type<tc>, window_params = [{transform_indices = @transform_0, window_bounds = array<i64: 24, 256>}, {transform_indices = @transform_1, window_bounds = array<i64: 24, 256>}, {pipeline_mode = #tpu.pipeline_mode<synchronous>, transform_indices = @transform_2, window_bounds = array<i64: 256, 256>}, {transform_indices = @transform_3, window_bounds = array<i64: 24, 128>}, {transform_indices = @transform_4, window_bounds = array<i64: 24, 128>}, {transform_indices = @transform_5, window_bounds = array<i64: 24, 128>}]} {
    %c0_i32 = arith.constant 0 : i32
    %0 = arith.cmpi eq, %arg1, %c0_i32 : i32
    %1 = arith.extui %0 : i1 to i32
    %c0_i32_0 = arith.constant 0 : i32
    %2 = arith.cmpi ne, %1, %c0_i32_0 : i32
    scf.if %2 {
      %cst_24 = arith.constant 0.000000e+00 : f32
      %50 = vector.broadcast %cst_24 : f32 to vector<24x128xf32>
      %c0_25 = arith.constant 0 : index
      %c0_26 = arith.constant 0 : index
      %51 = vector.load %arg5[%c0_25, %c0_26] : memref<24x128xf32, #tpu.memory_space<vmem>>, vector<24x128xf32>
      tpu.vector_store %arg5[%c0_25, %c0_26], %50 {strides = array<i32>} : memref<24x128xf32, #tpu.memory_space<vmem>>, vector<24x128xf32>,
      %cst_27 = arith.constant 0.000000e+00 : f32
      %52 = vector.broadcast %cst_27 : f32 to vector<24x128xf32>
      %c0_28 = arith.constant 0 : index
      %c0_29 = arith.constant 0 : index
      %53 = vector.load %arg6[%c0_28, %c0_29] : memref<24x128xf32, #tpu.memory_space<vmem>>, vector<24x128xf32>
      tpu.vector_store %arg6[%c0_28, %c0_29], %52 {strides = array<i32>} : memref<24x128xf32, #tpu.memory_space<vmem>>, vector<24x128xf32>,
      %cst_30 = arith.constant 0.000000e+00 : f32
      %54 = vector.broadcast %cst_30 : f32 to vector<24x128xf32>
      %c0_31 = arith.constant 0 : index
      %c0_32 = arith.constant 0 : index
      %55 = vector.load %arg7[%c0_31, %c0_32] : memref<24x128xf32, #tpu.memory_space<vmem>>, vector<24x128xf32>
      tpu.vector_store %arg7[%c0_31, %c0_32], %54 {strides = array<i32>} : memref<24x128xf32, #tpu.memory_space<vmem>>, vector<24x128xf32>,
    } else {
    }
    %c0 = arith.constant 0 : index
    %c0_1 = arith.constant 0 : index
    %3 = vector.load %arg4[%c0, %c0_1] : memref<256x256xbf16, #tpu.memory_space<vmem>>, vector<256x256xbf16>
    %c0_2 = arith.constant 0 : index
    %c0_3 = arith.constant 0 : index
    %4 = vector.load %arg2[%c0_2, %c0_3] : memref<24x256xbf16, #tpu.memory_space<vmem>>, vector<24x256xbf16>
    %cst = arith.constant dense<0.000000e+00> : vector<24x256xf32>
    %5 = tpu.matmul %4, %3, %cst {dimension_numbers = #tpu.dot_dimension_numbers<[1], [0], [0], [1], [0, 0, 1, 1], [], []>} : vector<24x256xbf16>, vector<256x256xbf16>, vector<24x256xf32> -> vector<24x256xf32>
    %c0_4 = arith.constant 0 : index
    %c0_5 = arith.constant 0 : index
    %6 = vector.load %arg3[%c0_4, %c0_5] : memref<24x256xbf16, #tpu.memory_space<vmem>>, vector<24x256xbf16>
    %cst_6 = arith.constant dense<0.000000e+00> : vector<24x256xf32>
    %7 = tpu.matmul %6, %3, %cst_6 {dimension_numbers = #tpu.dot_dimension_numbers<[1], [0], [0], [1], [0, 0, 1, 1], [], []>} : vector<24x256xbf16>, vector<256x256xbf16>, vector<24x256xf32> -> vector<24x256xf32>
    %8 = vector.extract_strided_slice %5 {offsets = [0, 0], sizes = [24, 128], strides = [1, 1]} : vector<24x256xf32> to vector<24x128xf32>
    %9 = vector.extract_strided_slice %5 {offsets = [0, 128], sizes = [24, 128], strides = [1, 1]} : vector<24x256xf32> to vector<24x128xf32>
    %10 = vector.extract_strided_slice %7 {offsets = [0, 0], sizes = [24, 128], strides = [1, 1]} : vector<24x256xf32> to vector<24x128xf32>
    %11 = vector.extract_strided_slice %7 {offsets = [0, 128], sizes = [24, 128], strides = [1, 1]} : vector<24x256xf32> to vector<24x128xf32>
    %12 = arith.mulf %8, %8 : vector<24x128xf32>
    %13 = arith.mulf %9, %9 : vector<24x128xf32>
    %14 = arith.addf %12, %13 : vector<24x128xf32>
    %cst_7 = arith.constant 1.000000e-07 : f32
    %15 = vector.broadcast %cst_7 : f32 to vector<24x128xf32>
    %16 = arith.maximumf %14, %15 : vector<24x128xf32>
    %17 = arith.mulf %10, %10 : vector<24x128xf32>
    %18 = arith.mulf %11, %11 : vector<24x128xf32>
    %19 = arith.addf %17, %18 : vector<24x128xf32>
    %cst_8 = arith.constant 1.000000e-07 : f32
    %20 = vector.broadcast %cst_8 : f32 to vector<24x128xf32>
    %21 = arith.maximumf %19, %20 : vector<24x128xf32>
    %c0_9 = arith.constant 0 : index
    %c0_10 = arith.constant 0 : index
    %22 = vector.load %arg5[%c0_9, %c0_10] : memref<24x128xf32, #tpu.memory_space<vmem>>, vector<24x128xf32>
    %23 = arith.addf %21, %16 : vector<24x128xf32>
    %24 = arith.mulf %21, %16 : vector<24x128xf32>
    %25 = math.sqrt %24 : vector<24x128xf32>
    %cst_11 = arith.constant 2.000000e+00 : f32
    %26 = vector.broadcast %cst_11 : f32 to vector<24x128xf32>
    %27 = arith.mulf %26, %25 : vector<24x128xf32>
    %28 = arith.subf %23, %27 : vector<24x128xf32>
    %29 = arith.addf %22, %28 : vector<24x128xf32>
    %c0_12 = arith.constant 0 : index
    %c0_13 = arith.constant 0 : index
    %30 = vector.load %arg5[%c0_12, %c0_13] : memref<24x128xf32, #tpu.memory_space<vmem>>, vector<24x128xf32>
    tpu.vector_store %arg5[%c0_12, %c0_13], %29 {strides = array<i32>} : memref<24x128xf32, #tpu.memory_space<vmem>>, vector<24x128xf32>,
    %c0_14 = arith.constant 0 : index
    %c0_15 = arith.constant 0 : index
    %31 = vector.load %arg7[%c0_14, %c0_15] : memref<24x128xf32, #tpu.memory_space<vmem>>, vector<24x128xf32>
    %32 = arith.divf %21, %16 : vector<24x128xf32>
    %33 = math.log %32 : vector<24x128xf32>
    %34 = math.absf %33 : vector<24x128xf32>
    %35 = arith.addf %31, %34 : vector<24x128xf32>
    %c0_16 = arith.constant 0 : index
    %c0_17 = arith.constant 0 : index
    %36 = vector.load %arg7[%c0_16, %c0_17] : memref<24x128xf32, #tpu.memory_space<vmem>>, vector<24x128xf32>
    tpu.vector_store %arg7[%c0_16, %c0_17], %35 {strides = array<i32>} : memref<24x128xf32, #tpu.memory_space<vmem>>, vector<24x128xf32>,
    %c1_i32 = arith.constant 1 : i32
    %37 = arith.muli %arg0, %c1_i32 : i32
    %38 = arith.addi %37, %arg1 : i32
    %c24_i32 = arith.constant 24 : i32
    %39 = arith.muli %38, %c24_i32 : i32
    %c24_i32_18 = arith.constant 24 : i32
    %40 = arith.addi %39, %c24_i32_18 : i32
    %c18_i32 = arith.constant 18 : i32
    %41 = arith.cmpi sle, %40, %c18_i32 : i32
    %42 = arith.extui %41 : i1 to i32
    %c0_i32_19 = arith.constant 0 : i32
    %43 = arith.cmpi ne, %42, %c0_i32_19 : i32
    scf.if %43 {
      %c0_24 = arith.constant 0 : index
      %c0_25 = arith.constant 0 : index
      %50 = vector.load %arg6[%c0_24, %c0_25] : memref<24x128xf32, #tpu.memory_space<vmem>>, vector<24x128xf32>
      %51 = arith.addf %50, %21 : vector<24x128xf32>
      %c0_26 = arith.constant 0 : index
      %c0_27 = arith.constant 0 : index
      %52 = vector.load %arg6[%c0_26, %c0_27] : memref<24x128xf32, #tpu.memory_space<vmem>>, vector<24x128xf32>
      tpu.vector_store %arg6[%c0_26, %c0_27], %51 {strides = array<i32>} : memref<24x128xf32, #tpu.memory_space<vmem>>, vector<24x128xf32>,
    } else {
    }
    %c18_i32_20 = arith.constant 18 : i32
    %44 = arith.cmpi slt, %39, %c18_i32_20 : i32
    %c24_i32_21 = arith.constant 24 : i32
    %45 = arith.addi %39, %c24_i32_21 : i32
    %c18_i32_22 = arith.constant 18 : i32
    %46 = arith.cmpi sgt, %45, %c18_i32_22 : i32
    %47 = arith.andi %44, %46 : i1
    %48 = arith.extui %47 : i1 to i32
    %c0_i32_23 = arith.constant 0 : i32
    %49 = arith.cmpi ne, %48, %c0_i32_23 : i32
    scf.if %49 {
      %50 = tpu.iota {dimensions = array<i32: 0>} : vector<24x1xi32>
      %51 = vector.broadcast %39 : i32 to vector<24x1xi32>
      %52 = arith.addi %51, %50 : vector<24x1xi32>
      %c0_24 = arith.constant 0 : index
      %c0_25 = arith.constant 0 : index
      %53 = vector.load %arg6[%c0_24, %c0_25] : memref<24x128xf32, #tpu.memory_space<vmem>>, vector<24x128xf32>
      %c18_i32_26 = arith.constant 18 : i32
      %54 = vector.broadcast %c18_i32_26 : i32 to vector<24x1xi32>
      %55 = arith.cmpi slt, %52, %54 : vector<24x1xi32>
      %cst_27 = arith.constant 0.000000e+00 : f32
      %56 = vector.shape_cast %55 : vector<24x1xi1> to vector<24x1xi1>
      %57 = vector.broadcast %56 : vector<24x1xi1> to vector<24x128xi1>
      %58 = vector.broadcast %cst_27 : f32 to vector<24x128xf32>
      %59 = arith.select %57, %21, %58 : vector<24x128xi1>, vector<24x128xf32>
      %60 = arith.addf %53, %59 : vector<24x128xf32>
      %c0_28 = arith.constant 0 : index
      %c0_29 = arith.constant 0 : index
      %61 = vector.load %arg6[%c0_28, %c0_29] : memref<24x128xf32, #tpu.memory_space<vmem>>, vector<24x128xf32>
      tpu.vector_store %arg6[%c0_28, %c0_29], %60 {strides = array<i32>} : memref<24x128xf32, #tpu.memory_space<vmem>>, vector<24x128xf32>,
    } else {
    }
    return
  }
  func.func @transform_0(%arg0: i32, %arg1: i32) -> (i32, i32) {
    %c1_i32 = arith.constant 1 : i32
    %0 = arith.muli %arg0, %c1_i32 : i32
    %1 = arith.addi %0, %arg1 : i32
    %c0_i32 = arith.constant 0 : i32
    %c0_i32_0 = arith.constant 0 : i32
    return %1, %c0_i32 : i32, i32
  }
  func.func @transform_1(%arg0: i32, %arg1: i32) -> (i32, i32) {
    %c1_i32 = arith.constant 1 : i32
    %0 = arith.muli %arg0, %c1_i32 : i32
    %1 = arith.addi %0, %arg1 : i32
    %c0_i32 = arith.constant 0 : i32
    %c0_i32_0 = arith.constant 0 : i32
    return %1, %c0_i32 : i32, i32
  }
  func.func @transform_2(%arg0: i32, %arg1: i32) -> (i32, i32) {
    %c0_i32 = arith.constant 0 : i32
    %c0_i32_0 = arith.constant 0 : i32
    %c0_i32_1 = arith.constant 0 : i32
    return %c0_i32, %c0_i32_0 : i32, i32
  }
  func.func @transform_3(%arg0: i32, %arg1: i32) -> (i32, i32) {
    %c0_i32 = arith.constant 0 : i32
    %c0_i32_0 = arith.constant 0 : i32
    return %arg0, %c0_i32 : i32, i32
  }
  func.func @transform_4(%arg0: i32, %arg1: i32) -> (i32, i32) {
    %c0_i32 = arith.constant 0 : i32
    %c0_i32_0 = arith.constant 0 : i32
    return %arg0, %c0_i32 : i32, i32
  }
  func.func @transform_5(%arg0: i32, %arg1: i32) -> (i32, i32) {
    %c0_i32 = arith.constant 0 : i32
    %c0_i32_0 = arith.constant 0 : i32
    return %arg0, %c0_i32 : i32, i32
  }
}

</mosaic_0001>

<bundles_post_ra>
// kernel: stft_loss.1
= control target key start
LH: loop header
LB: loop body
LE: loop exit
PB: predicated region body
PF: predicated region fallthrough
CT: control target
= control target key end

     0   :  { %s1155_s18 = smov 0   ;;  %s1157_s19 = smov 0   ;;  %s1387_s0 = inlined_call_operand.vmem [shape: bf16[48,256], index: 0, kind: input, shape index: {}]   ;;  %s1388_s1 = inlined_call_operand.vmem [shape: bf16[48,256], index: 1, kind: input, shape index: {}]   ;;  %s1389_s2 = inlined_call_operand.vmem [shape: bf16[256,256], index: 2, kind: input, shape index: {}]   ;;  %s1390_s3 = inlined_call_operand.vmem [shape: f32[48,128], index: 3, kind: output, shape index: {0}]   ;;  %s1391_s4 = inlined_call_operand.vmem [shape: f32[48,128], index: 4, kind: output, shape index: {1}]   ;;  %s1392_s5 = inlined_call_operand.vmem [shape: f32[48,128], index: 5, kind: output, shape index: {2}]  }
   0x1   :  { %s1159_s20 = smov 0  }
   0x2 LB: > { %s28_s21 = sadd.s32 1, %s1118_s19  ;;  %p946_p0 = scmp.ge.s32.totalorder %s1122_s20, 1  ;;  %s1122_s20 = sphi %s1159_s20, %s16_s20   ;;  %s1118_s19 = sphi %s1157_s19, %s1395_s19   ;;  %s1114_s18 = sphi %s1155_s18, %s1394_s18  }
   0x3   : > { %p30_p1 = scmp.ge.s32.totalorder %s28_s21, 2  ;;  %p226_p2 = scmp.lt.s32.totalorder %s1122_s20, 3 }
   0x5   : > { %s1397_s21 = smov (%p30_p1, %s28_s21), 0  ;;  %p227_p3 = pnand %p946_p0, %p226_p2 }
   0x6   : > { %v1024_v0 = vld [vmem:[%s1389_s2 + $0x4] ss:$8 sps:$4 sm:$0xff] (!%p227_p3)   ;;  %s274_s24 = smul.u32 (!%p227_p3), 3, %s1114_s18  ;;  %v1026_v1 = vld [vmem:[%s1389_s2] ss:$8 sps:$4 sm:$0xff] (!%p227_p3)   ;;  %v1124_v7 = vmov (!%p227_p3), 0.0  }
   0x7   : > { %230 = sbr.rel (%p227_p3) target bundleno = 343 (0x157), region = 32  ;;  %534 = vmatprep.subr.bf16.mxu0 (!%p227_p3), %v1024_v0  ;;  %605 = vmatprep.subr.bf16.mxu1 (!%p227_p3), %v1024_v0  ;;  %v1027_v2 = vld [vmem:[%s1389_s2 + $0x14] ss:$8 sps:$4 sm:$0xff] (!%p227_p3)   ;;  %v1029_v3 = vld [vmem:[%s1389_s2 + $0x10] ss:$8 sps:$4 sm:$0xff] (!%p227_p3)  }
   0x8   : > { %p275_p4 = scmp.lt.s32.totalorder (!%p227_p3), %s274_s24, 5  ;;  %535 = vmatpush1.bf16.msra.mxu0 (!%p227_p3), %v1026_v1  ;;  %606 = vmatpush1.bf16.msra.mxu1 (!%p227_p3), %v1026_v1  ;;  %v1030_v4 = vld [vmem:[%s1389_s2 + $0x24] ss:$8 sps:$4 sm:$0xff] (!%p227_p3)   ;;  %v1032_v5 = vld [vmem:[%s1389_s2 + $0x20] ss:$8 sps:$4 sm:$0xff] (!%p227_p3)   ;;  %s1320_s7 = smul.u32 (!%p227_p3), 24, %s1114_s18 }
   0x9   : > { %536 = vmatprep.subr.bf16.mxu0 (!%p227_p3), %v1027_v2  ;;  %607 = vmatprep.subr.bf16.mxu1 (!%p227_p3), %v1027_v2  ;;  %v1033_v6 = vld [vmem:[%s1389_s2 + $0x34] ss:$8 sps:$4 sm:$0xff] (!%p227_p3)   ;;  %v1035_v8 = vld [vmem:[%s1389_s2 + $0x30] ss:$8 sps:$4 sm:$0xff] (!%p227_p3)   ;;  %v1036_v9 = vld [vmem:[%s1389_s2 + $0x44] ss:$8 sps:$4 sm:$0xff] (!%p227_p3)  }
   0xa   : > { %v1038_v10 = vld [vmem:[%s1389_s2 + $0x40] ss:$8 sps:$4 sm:$0xff] (!%p227_p3)   ;;  %v1039_v11 = vld [vmem:[%s1389_s2 + $0x54] ss:$8 sps:$4 sm:$0xff] (!%p227_p3)   ;;  %v1041_v12 = vld [vmem:[%s1389_s2 + $0x50] ss:$8 sps:$4 sm:$0xff] (!%p227_p3)  }
   0xb   : > { %v1042_v13 = vld [vmem:[%s1389_s2 + $0x64] ss:$8 sps:$4 sm:$0xff] (!%p227_p3)   ;;  %v1044_v15 = vld [vmem:[%s1389_s2 + $0x60] ss:$8 sps:$4 sm:$0xff] (!%p227_p3)   ;;  %v1045_v17 = vld [vmem:[%s1389_s2 + $0x74] ss:$8 sps:$4 sm:$0xff] (!%p227_p3)  }
   0xc   : > { %537 = vmatpush1.bf16.msra.mxu0 (!%p227_p3), %v1029_v3  ;;  %608 = vmatpush1.bf16.msra.mxu1 (!%p227_p3), %v1029_v3  ;;  %v1047_v18 = vld [vmem:[%s1389_s2 + $0x70] ss:$8 sps:$4 sm:$0xff] (!%p227_p3)   ;;  %v1048_v19 = vld [vmem:[%s1389_s2 + $0x84] ss:$8 sps:$4 sm:$0xff] (!%p227_p3)   ;;  %v1050_v20 = vld [vmem:[%s1389_s2 + $0x80] ss:$8 sps:$4 sm:$0xff] (!%p227_p3)  }
   0xd   : > { %538 = vmatprep.subr.bf16.mxu0 (!%p227_p3), %v1030_v4  ;;  %609 = vmatprep.subr.bf16.mxu1 (!%p227_p3), %v1030_v4  ;;  %v1051_v21 = vld [vmem:[%s1389_s2 + $0x94] ss:$8 sps:$4 sm:$0xff] (!%p227_p3)   ;;  %v1053_v22 = vld [vmem:[%s1389_s2 + $0x90] ss:$8 sps:$4 sm:$0xff] (!%p227_p3)   ;;  %v1054_v23 = vld [vmem:[%s1389_s2 + $0xa4] ss:$8 sps:$4 sm:$0xff] (!%p227_p3)  }
   0xe   : > { %s1399_s24 = smov (!%p275_p4, %s274_s24), 5  ;;  %v1056_v24 = vld [vmem:[%s1389_s2 + $0xa0] ss:$8 sps:$4 sm:$0xff]   ;;  %v1057_v25 = vld [vmem:[%s1389_s2 + $0xb4] ss:$8 sps:$4 sm:$0xff]   ;;  %s748_s9 = sadd.s32 24, %s1320_s7 }
   0xf   : > { %s1191_s8 = sshll.u32 %s1399_s24, 3  ;;  %v1059_v26 = vld [vmem:[%s1389_s2 + $0xb0] ss:$8 sps:$4 sm:$0xff]   ;;  %v1060_v27 = vld [vmem:[%s1389_s2 + $0xc4] ss:$8 sps:$4 sm:$0xff]   ;;  %p1350_p5 = scmp.gt.s32.totalorder %s748_s9, 18 }
  0x10   : > { %s1200_s13 = scalar_lea.vmem %s1390_s3, %s1191_s8  ;;  %s1209_s22 = scalar_lea.vmem %s1391_s4, %s1191_s8  ;;  %539 = vmatpush1.bf16.msra.mxu0 %v1032_v5  ;;  %610 = vmatpush1.bf16.msra.mxu1 %v1032_v5  ;;  %v1062_v28 = vld [vmem:[%s1389_s2 + $0xc0] ss:$8 sps:$4 sm:$0xff]   ;;  %v1063_v29 = vld [vmem:[%s1389_s2 + $0xd4] ss:$8 sps:$4 sm:$0xff]   ;;  %v1065_v30 = vld [vmem:[%s1389_s2 + $0xd0] ss:$8 sps:$4 sm:$0xff]  }
  0x11   : > { %s1215_s25 = scalar_lea.vmem %s1392_s5, %s1191_s8  ;;  %313 = vst [vmem:[%s1200_s13] sm:$0xff] %v1124_v7  ;;  %314 = vst [vmem:[%s1200_s13 + $0x8] sm:$0xff] %v1124_v7  ;;  %540 = vmatprep.subr.bf16.mxu0 %v1033_v6  ;;  %611 = vmatprep.subr.bf16.mxu1 %v1033_v6  ;;  %s1245_s15 = scalar_lea.vmem %s1387_s0, %s1191_s8  ;;  %v1066_v31 = vld [vmem:[%s1389_s2 + $0xe4] ss:$8 sps:$4 sm:$0xff]   ;;  %v1068_v32 = vld [vmem:[%s1389_s2 + $0xe0] ss:$8 sps:$4 sm:$0xff]  }
  0x12   : > { %316 = vst [vmem:[%s1209_s22] sm:$0xff] %v1124_v7  ;;  %319 = vst [vmem:[%s1215_s25] sm:$0xff] %v1124_v7  ;;  %s1254_s26 = scalar_lea.vmem %s1388_s1, %s1191_s8  ;;  %v1074_v14 = vld [vmem:[%s1245_s15 + $0x4] ss:$8 sps:$4 sm:$0xff]   ;;  %v1069_v33 = vld [vmem:[%s1389_s2 + $0xf4] ss:$8 sps:$4 sm:$0xff]  }
  0x13   : > { %315 = vst [vmem:[%s1200_s13 + $0x10] sm:$0xff] %v1124_v7  ;;  %317 = vst [vmem:[%s1209_s22 + $0x8] sm:$0xff] %v1124_v7  ;;  %v1077_v16 = vld [vmem:[%s1254_s26 + $0x4] ss:$8 sps:$4 sm:$0xff]   ;;  %566 = vmatprep.mubr.bf16.mxu0 %v1074_v14  ;;  %v1071_v34 = vld [vmem:[%s1389_s2 + $0xf0] ss:$8 sps:$4 sm:$0xff]  }
  0x14   : > { %320 = vst [vmem:[%s1215_s25 + $0x8] sm:$0xff] %v1124_v7  ;;  %318 = vst [vmem:[%s1209_s22 + $0x10] sm:$0xff] %v1124_v7  ;;  %541 = vmatpush1.bf16.msra.mxu0 %v1035_v8  ;;  %612 = vmatpush1.bf16.msra.mxu1 %v1035_v8  ;;  %v356_v35 = vld [vmem:[%s1245_s15 + $0x10] sm:$0xff]  ;;  %v1072_v37 = vld [vmem:[%s1245_s15] ss:$8 sps:$4 sm:$0xff]  }
  0x15   : > { %321 = vst [vmem:[%s1215_s25 + $0x10] sm:$0xff] %v1124_v7  ;;  %542 = vmatprep.subr.bf16.mxu0 %v1036_v9  ;;  %613 = vmatprep.subr.bf16.mxu1 %v1036_v9  ;;  %v587_v36 = vld [vmem:[%s1254_s26 + $0x10] sm:$0xff]  ;;  %v1075_v38 = vld [vmem:[%s1254_s26] ss:$8 sps:$4 sm:$0xff]   ;;  %v957_v39 = vcombine.high %v356_v35, %v356_v35  ;;  %v956_v41 = vcombine.low %v356_v35, %v356_v35 }
  0x16   : > { %637 = vmatprep.mubr.bf16.mxu1 %v1077_v16  ;;  %v993_v40 = vcombine.high %v587_v36, %v587_v36  ;;  %v992_v42 = vcombine.low %v587_v36, %v587_v36 }
  0x18   : > { %543 = vmatpush1.bf16.msra.mxu0 %v1038_v10  ;;  %614 = vmatpush1.bf16.msra.mxu1 %v1038_v10 }
  0x19   : > { %544 = vmatprep.subr.bf16.mxu0 %v1039_v11  ;;  %615 = vmatprep.subr.bf16.mxu1 %v1039_v11 }
  0x1c   : > { %545 = vmatpush1.bf16.msra.mxu0 %v1041_v12  ;;  %616 = vmatpush1.bf16.msra.mxu1 %v1041_v12 }
  0x1d   : > { %546 = vmatprep.subr.bf16.mxu0 %v1042_v13  ;;  %617 = vmatprep.subr.bf16.mxu1 %v1042_v13 }
  0x20   : > { %547 = vmatpush1.bf16.msra.mxu0 %v1044_v15  ;;  %618 = vmatpush1.bf16.msra.mxu1 %v1044_v15 }
  0x21   : > { %548 = vmatprep.subr.bf16.mxu0 %v1045_v17  ;;  %619 = vmatprep.subr.bf16.mxu1 %v1045_v17 }
  0x24   : > { %549 = vmatpush1.bf16.msra.mxu0 %v1047_v18  ;;  %620 = vmatpush1.bf16.msra.mxu1 %v1047_v18 }
  0x25   : > { %550 = vmatprep.subr.bf16.mxu0 %v1048_v19  ;;  %621 = vmatprep.subr.bf16.mxu1 %v1048_v19 }
  0x28   : > { %551 = vmatpush1.bf16.msra.mxu0 %v1050_v20  ;;  %622 = vmatpush1.bf16.msra.mxu1 %v1050_v20 }
  0x29   : > { %552 = vmatprep.subr.bf16.mxu0 %v1051_v21  ;;  %623 = vmatprep.subr.bf16.mxu1 %v1051_v21 }
  0x2c   : > { %553 = vmatpush1.bf16.msra.mxu0 %v1053_v22  ;;  %624 = vmatpush1.bf16.msra.mxu1 %v1053_v22 }
  0x2d   : > { %554 = vmatprep.subr.bf16.mxu0 %v1054_v23  ;;  %625 = vmatprep.subr.bf16.mxu1 %v1054_v23 }
  0x30   : > { %555 = vmatpush1.bf16.msra.mxu0 %v1056_v24  ;;  %626 = vmatpush1.bf16.msra.mxu1 %v1056_v24 }
  0x31   : > { %556 = vmatprep.subr.bf16.mxu0 %v1057_v25  ;;  %627 = vmatprep.subr.bf16.mxu1 %v1057_v25 }
  0x34   : > { %557 = vmatpush1.bf16.msra.mxu0 %v1059_v26  ;;  %628 = vmatpush1.bf16.msra.mxu1 %v1059_v26 }
  0x35   : > { %558 = vmatprep.subr.bf16.mxu0 %v1060_v27  ;;  %629 = vmatprep.subr.bf16.mxu1 %v1060_v27 }
  0x38   : > { %559 = vmatpush1.bf16.msra.mxu0 %v1062_v28  ;;  %630 = vmatpush1.bf16.msra.mxu1 %v1062_v28 }
  0x39   : > { %560 = vmatprep.subr.bf16.mxu0 %v1063_v29  ;;  %631 = vmatprep.subr.bf16.mxu1 %v1063_v29 }
  0x3c   : > { %561 = vmatpush1.bf16.msra.mxu0 %v1065_v30  ;;  %632 = vmatpush1.bf16.msra.mxu1 %v1065_v30 }
  0x3d   : > { %562 = vmatprep.subr.bf16.mxu0 %v1066_v31  ;;  %633 = vmatprep.subr.bf16.mxu1 %v1066_v31 }
  0x40   : > { %563 = vmatpush1.bf16.msra.mxu0 %v1068_v32  ;;  %634 = vmatpush1.bf16.msra.mxu1 %v1068_v32 }
  0x41   : > { %564 = vmatprep.subr.bf16.mxu0 %v1069_v33  ;;  %635 = vmatprep.subr.bf16.mxu1 %v1069_v33 }
  0x44   : > { %565 = vmatpush1.bf16.msra.mxu0 %v1071_v34  ;;  %636 = vmatpush1.bf16.msra.mxu1 %v1071_v34 }
  0x47   : > { %567 = vmatmul.mubr.bf16.vlgmr.msra.gmra.mrb[0].mxu0 %v1072_v37  ;;  %638 = vmatmul.mubr.bf16.vlgmr.msra.gmra.mrb[0].mxu1 %v1075_v38  ;;  %v680_v38 = vld [vmem:[%s1200_s13] sm:$0xff] }
  0x48   : > { %576 = vmatprep.mubr.bf16.mxu0 %v957_v39  ;;  %647 = vmatprep.mubr.bf16.mxu1 %v993_v40 }
  0x4f   : > { %577 = vmatmul.mubr.bf16.gmra.mrb[4].mxu0 %v956_v41  ;;  %648 = vmatmul.mubr.bf16.gmra.mrb[4].mxu1 %v992_v42 }
 0x11a   : > { %v568_v43 = vpop.f32.mrb[0].mxu0  ;;  %v639_v44 = vpop.f32.mrb[0].mxu1 }
 0x11b   : > { %v656_v45 = vmul.f32 %v568_v43, %v568_v43  ;;  %v668_v46 = vmul.f32 %v639_v44, %v639_v44  ;;  %v570_v47 = vpop.f32.mrb[1].mxu0  ;;  %v641_v48 = vpop.f32.mrb[1].mxu1  ;;  %v681_v43 = vld [vmem:[%s1200_s13 + $0x8] sm:$0xff] }
 0x11c   : > { %v659_v49 = vmul.f32 %v570_v47, %v570_v47  ;;  %v671_v50 = vmul.f32 %v641_v48, %v641_v48  ;;  %v572_v51 = vpop.f32.mrb[2].mxu0  ;;  %v643_v52 = vpop.f32.mrb[2].mxu1 }
 0x11d   : > { %v657_v53 = vmul.f32 %v572_v51, %v572_v51  ;;  %v669_v54 = vmul.f32 %v643_v52, %v643_v52  ;;  %v574_v55 = vpop.f32.mrb[3].mxu0  ;;  %v645_v56 = vpop.f32.mrb[3].mxu1 }
 0x11e   : > { %v662_v57 = vadd.f32 %v659_v49, %v656_v45  ;;  %v674_v58 = vadd.f32 %v671_v50, %v668_v46  ;;  %v660_v59 = vmul.f32 %v574_v55, %v574_v55  ;;  %v672_v60 = vmul.f32 %v645_v56, %v645_v56 }
 0x120   : > { %v665_v61 = vmax.f32 %v662_v57, 1e-07  ;;  %v1323_v62 = vmax.f32 %v674_v58, 1e-07  ;;  %v663_v63 = vadd.f32 %v660_v59, %v657_v53  ;;  %v675_v0 = vadd.f32 %v672_v60, %v669_v54  ;;  %v722_v54 = vld [vmem:[%s1215_s25] sm:$0xff]  ;;  %v723_v59 = vld [vmem:[%s1215_s25 + $0x8] sm:$0xff] }
 0x122   : > { %1082 = vrcp.f32 %v665_v61  ;;  %v683_v1 = vadd.f32 %v1323_v62, %v665_v61  ;;  %v686_v2 = vmul.f32 %v1323_v62, %v665_v61  ;;  %v666_v3 = vmax.f32 %v663_v63, 1e-07  ;;  %v578_v4 = vpop.f32.mrb[4].mxu0  ;;  %v649_v5 = vpop.f32.mrb[4].mxu1 }
 0x123   : > { %v1327_v6 = vmax.f32 %v675_v0, 1e-07  ;;  %v580_v7 = vpop.f32.mrb[5].mxu0  ;;  %v651_v8 = vpop.f32.mrb[5].mxu1  ;;  %v658_v9 = vmul.f32 %v578_v4, %v578_v4  ;;  %v670_v10 = vmul.f32 %v649_v5, %v649_v5 }
 0x124   : > { %1084 = vrsqrt.f32 %v686_v2  ;;  %v582_v11 = vpop.f32.mrb[6].mxu0  ;;  %v653_v12 = vpop.f32.mrb[6].mxu1  ;;  %v661_v15 = vmul.f32 %v580_v7, %v580_v7  ;;  %v673_v18 = vmul.f32 %v651_v8, %v651_v8  ;;  %vm691_vm0 = vcmp.eq.f32.partialorder %v686_v2, inf  ;;  %v753_v7 = vld [vmem:[%s1209_s22] sm:$0xff] (!%p1350_p5)  ;;  %v754_v8 = vld [vmem:[%s1209_s22 + $0x8] sm:$0xff] (!%p1350_p5) }
 0x125   : > { %1086 = vrcp.f32 %v666_v3  ;;  %v684_v13 = vadd.f32 %v1327_v6, %v666_v3  ;;  %v687_v14 = vmul.f32 %v1327_v6, %v666_v3  ;;  %v583_v16 = vpop.f32.mrb[7].mxu0  ;;  %v654_v17 = vpop.f32.mrb[7].mxu1  ;;  %v694_v30 = vand.u32 2147483648, %v686_v2 }
 0x126   : > { %v664_v19 = vadd.f32 %v661_v15, %v658_v9  ;;  %v676_v20 = vadd.f32 %v673_v18, %v670_v10  ;;  %vm693_vm1 = vcmp.eq.f32.partialorder %v686_v2, 0.0  ;;  %v755_v9 = vld [vmem:[%s1209_s22 + $0x10] sm:$0xff] (!%p1350_p5)  ;;  %v756_v10 = vadd.f32 (!%p1350_p5), %v753_v7, %v1323_v62 }
 0x127   : > { %1088 = vrsqrt.f32 %v687_v14  ;;  %vm698_vm2 = vcmp.eq.f32.partialorder %v687_v14, inf  ;;  %v701_v37 = vand.u32 2147483648, %v687_v14  ;;  %vm700_vm3 = vcmp.eq.f32.partialorder %v687_v14, 0.0 }
 0x128   : > { %v667_v21 = vmax.f32 %v664_v19, 1e-07  ;;  %v1331_v22 = vmax.f32 %v676_v20, 1e-07  ;;  %v757_v11 = vadd.f32 (!%p1350_p5), %v754_v8, %v1327_v6  ;;  %759 = vst [vmem:[%s1209_s22] sm:$0xff] (!%p1350_p5), %v756_v10 }
 0x12a   : > { %1090 = vrcp.f32 %v667_v21  ;;  %v685_v24 = vadd.f32 %v1331_v22, %v667_v21  ;;  %v688_v25 = vmul.f32 %v1331_v22, %v667_v21  ;;  %v758_v12 = vadd.f32 (!%p1350_p5), %v755_v9, %v1331_v22  ;;  %760 = vst [vmem:[%s1209_s22 + $0x8] sm:$0xff] (!%p1350_p5), %v757_v11 }
 0x12c   : > { %v1083_v23 = vpop.eup %1082  ;;  %1092 = vrsqrt.f32 %v688_v25  ;;  %vm705_vm4 = vcmp.eq.f32.partialorder %v688_v25, inf  ;;  %v708_v53 = vand.u32 2147483648, %v688_v25  ;;  %vm707_vm5 = vcmp.eq.f32.partialorder %v688_v25, 0.0  ;;  %761 = vst [vmem:[%s1209_s22 + $0x10] sm:$0xff] (!%p1350_p5), %v758_v12 }
 0x12d   : > { %v726_v26 = vmul.f32 %v1083_v23, %v1323_v62 }
 0x12e   : > { %v1085_v27 = vpop.eup %1084 }
 0x12f   : > { %v1087_v28 = vpop.eup %1086  ;;  %v690_v29 = vmul.f32 %v1085_v27, %v686_v2  ;;  %1094 = vlog2.f32 %v726_v26 }
 0x130   : > { %v728_v31 = vmul.f32 %v1087_v28, %v1327_v6 }
 0x131   : > { %v1089_v32 = vpop.eup %1088  ;;  %v692_v33 = vsel %vm691_vm0, %v686_v2, %v690_v29 }
 0x132   : > { %v695_v34 = vsel %vm693_vm1, %v694_v30, %v692_v33  ;;  %v697_v35 = vmul.f32 %v1089_v32, %v687_v14  ;;  %1096 = vlog2.f32 %v728_v31 }
 0x133   : > { %v710_v36 = vmul.f32 2.0, %v695_v34 }
 0x134   : > { %v699_v39 = vsel %vm698_vm2, %v687_v14, %v697_v35  ;;  %v1091_v42 = vpop.eup %1090 }
 0x135   : > { %v713_v40 = vsub.f32 %v683_v1, %v710_v36  ;;  %v702_v41 = vsel %vm700_vm3, %v701_v37, %v699_v39  ;;  %v730_v46 = vmul.f32 %v1091_v42, %v1331_v22 }
 0x136   : > { %v711_v44 = vmul.f32 2.0, %v702_v41  ;;  %v1093_v47 = vpop.eup %1092 }
 0x137   : > { %v716_v45 = vadd.f32 %v713_v40, %v680_v38  ;;  %v704_v50 = vmul.f32 %v1093_v47, %v688_v25  ;;  %1098 = vlog2.f32 %v730_v46 }
 0x138   : > { %v714_v48 = vsub.f32 %v684_v13, %v711_v44 }
 0x139   : > { %v1095_v49 = vpop.eup %1094  ;;  %719 = vst [vmem:[%s1200_s13] sm:$0xff] %v716_v45  ;;  %v706_v55 = vsel %vm705_vm4, %v688_v25, %v704_v50 }
 0x13a   : > { %v732_v51 = vmul.f32 0.6931472, %v1095_v49  ;;  %v717_v52 = vadd.f32 %v714_v48, %v681_v43  ;;  %v709_v58 = vsel %vm707_vm5, %v708_v53, %v706_v55 }
 0x13b   : > { %v712_v61 = vmul.f32 2.0, %v709_v58 }
 0x13c   : > { %v1097_v56 = vpop.eup %1096  ;;  %v737_v57 = vand.u32 2147483647, %v732_v51  ;;  %720 = vst [vmem:[%s1200_s13 + $0x8] sm:$0xff] %v717_v52 }
 0x13d   : > { %v734_v60 = vmul.f32 0.6931472, %v1097_v56  ;;  %v715_v1 = vsub.f32 %v685_v24, %v712_v61 }
 0x13e   : > { %v740_v63 = vadd.f32 %v737_v57, %v722_v54 }
 0x13f   : > { %v738_v0 = vand.u32 2147483647, %v734_v60  ;;  %721 = vst [vmem:[%s1200_s13 + $0x10] sm:$0xff] %v715_v1 }
 0x140   : > { %743 = vst [vmem:[%s1215_s25] sm:$0xff] %v740_v63  ;;  %752 = sbr.rel (%p1350_p5) target bundleno = 327 (0x147), region = 40 }
 0x141   : > { %v741_v2 = vadd.f32 %v738_v0, %v723_v59  ;;  %v1099_v3 = vpop.eup %1098 }
 0x142   : > { %v736_v4 = vmul.f32 0.6931472, %v1099_v3 }
 0x143   : > { %744 = vst [vmem:[%s1215_s25 + $0x8] sm:$0xff] %v741_v2 }
 0x144   : > { %v739_v5 = vand.u32 2147483647, %v736_v4 }
 0x146   : > { %745 = vst [vmem:[%s1215_s25 + $0x10] sm:$0xff] %v739_v5 }
 0x147 PF: > { %p762_p6 = scmp.lt.s32.totalorder %s1320_s7, 18 }
 0x149   : > { %p764_p7 = pnand %p1350_p5, %p762_p6 }
 0x14a   : > { %v768_v13 = vlaneseq (!%p764_p7)  ;;  %v772_v14 = vstv (!%p764_p7), %s1320_s7  ;;  %v776_v19 = vld [vmem:[%s1209_s22] sm:$0xff] (!%p764_p7)  ;;  %v777_v23 = vld [vmem:[%s1209_s22 + $0x8] sm:$0xff] (!%p764_p7)  ;;  %v778_v24 = vld [vmem:[%s1209_s22 + $0x10] sm:$0xff] (!%p764_p7) }
 0x14b   : > { %767 = sbr.rel (%p764_p7) target bundleno = 343 (0x157), region = 44 }
 0x14c   : > { %v769_v15 = vshrl.u32 (!%p764_p7), %v768_v13, 7 }
 0x14e   : > { %v770_v16 = vadd.s32 (!%p764_p7), 8, %v769_v15  ;;  %v773_v17 = vadd.s32 (!%p764_p7), %v772_v14, %v769_v15  ;;  %v771_v18 = vadd.s32 (!%p764_p7), 16, %v769_v15 }
 0x150   : > { %v774_v20 = vadd.s32 (!%p764_p7), %v772_v14, %v770_v16  ;;  %vm779_vm6 = vcmp.lt.s32.totalorder (!%p764_p7), %v773_v17, 18  ;;  %v775_v21 = vadd.s32 (!%p764_p7), %v772_v14, %v771_v18 }
 0x151   : > { %v788_v25 = vsel (!%p764_p7), %vm779_vm6, %v1323_v62, 0.0 }
 0x152   : > { %vm780_vm7 = vcmp.lt.s32.totalorder %v774_v20, 18  ;;  %v791_v26 = vadd.f32 %v788_v25, %v776_v19  ;;  %vm781_vm8 = vcmp.lt.s32.totalorder %v775_v21, 18 }
 0x153   : > { %v789_v27 = vsel %vm780_vm7, %v1327_v6, 0.0  ;;  %v790_v28 = vsel %vm781_vm8, %v1331_v22, 0.0 }
 0x154   : > { %v792_v29 = vadd.f32 %v789_v27, %v777_v23  ;;  %794 = vst [vmem:[%s1209_s22] sm:$0xff] %v791_v26  ;;  %v793_v30 = vadd.f32 %v790_v28, %v778_v24 }
 0x156   : > { %795 = vst [vmem:[%s1209_s22 + $0x8] sm:$0xff] %v792_v29  ;;  %796 = vst [vmem:[%s1209_s22 + $0x10] sm:$0xff] %v793_v30 }
 0x157 PF: > { %s16_s20 = sadd.s32 1, %s1122_s20   ;;  %s1394_s18 = smov %s1118_s19 }
 0x158   : > { %p13_p8 = scmp.ge.s32.totalorder %s16_s20, 4   ;;  %s1395_s19 = smov %s1397_s21 }
 0x15a   :  { %15 = sbr.rel (!%p13_p8) target bundleno = 2 (0x2), region = 101 }

</bundles_post_ra>
